<compile_context>
chip_gen: v7x
topology: tpu7x:2x2x1
jax: 0.10.0
libtpu: 0.0.40
codegen_flags: <defaults>
</compile_context>

<pallas_src>
import math

import jax
import jax.numpy as jnp
from jax.experimental import pallas as pl
from jax.experimental.pallas import tpu as pltpu


_INV_SQRT2 = 1.0 / math.sqrt(2.0)


def _gelu_exact(x):
    # Matches torch.nn.GELU() default (exact erf form).
    return 0.5 * x * (1.0 + jax.lax.erf(x * _INV_SQRT2))


def _make_kernel(k, c, g, chunk):
    """Build the SplitAttention kernel.

    x_ref : (Bt, K, rows, lanes)   lanes = g*c ; lane l maps to channel l % c
    w1_ref: (C, C)                 mlp1.weight.T
    w2_ref: (C, K*C)               mlp2.weight.T
    o_ref : (Bt, rows, lanes)

    g == 1 is the "direct" layout (lanes == C); g > 1 is the lane-dense flat
    layout (lanes == 128, requires 128 % C == 0).  `chunk` is the number of
    sublane rows processed per inner-loop step.
    """
    lanes = g * c

    def kernel(x_ref, w1_ref, w2_ref, o_ref):
        f32 = jnp.float32
        bt = x_ref.shape[0]
        rows = x_ref.shape[2]
        n_full = rows // chunk
        tail = rows - n_full * chunk

        # ---- phase 1: a[b, c] = sum over splits & rows (chunked) -------------
        def _partial_sum(start, size):
            s = jnp.zeros((bt, lanes), f32)
            for kk in range(k):                         # unrolled over splits
                s = s + jnp.sum(
                    x_ref[:, kk, pl.ds(start, size), :].astype(f32), axis=1)
            return s

        def _red_body(i, s):
            start = pl.multiple_of(i * chunk, chunk)
            return s + _partial_sum(start, chunk)

        s = jax.lax.fori_loop(0, n_full, _red_body,
                              jnp.zeros((bt, lanes), f32))
        if tail > 0:
            s = s + _partial_sum(n_full * chunk, tail)

        # Fold the g lane groups into C channels (identity when g == 1).
        a = s[:, 0:c]
        for gg in range(1, g):
            a = a + s[:, gg * c:(gg + 1) * c]           # (Bt, C)

        # ---- MLP + softmax over the split axis --------------------------------
        h1 = jnp.dot(a, w1_ref[...].astype(f32), preferred_element_type=f32)
        h2 = jnp.dot(_gelu_exact(h1), w2_ref[...].astype(f32),
                     preferred_element_type=f32)        # (Bt, K*C)
        hat = h2.reshape(bt, k, c)
        m = jnp.max(hat, axis=1, keepdims=True)
        e = jnp.exp(hat - m)
        bar = e / jnp.sum(e, axis=1, keepdims=True)     # (Bt, K, C)

        # Expand attention weights to full lane width (channel of lane l = l%c).
        bar_lane = jnp.tile(bar, (1, 1, g)) if g > 1 else bar   # (Bt, K, lanes)

        # ---- phase 2: weighted sum over splits, chunked, stored per chunk -----
        def _ws_chunk(start, size):
            acc = (x_ref[:, 0, pl.ds(start, size), :].astype(f32)
                   * bar_lane[:, 0:1, :])
            for kk in range(1, k):
                acc = acc + (x_ref[:, kk, pl.ds(start, size), :].astype(f32)
                             * bar_lane[:, kk:kk + 1, :])
            o_ref[:, pl.ds(start, size), :] = acc.astype(o_ref.dtype)

        if n_full > 0:
            @pl.loop(0, n_full)
            def _(i):
                start = pl.multiple_of(i * chunk, chunk)
                _ws_chunk(start, chunk)

        if tail > 0:
            _ws_chunk(n_full * chunk, tail)

    return kernel


def _tpu_vmem_and_cores():
    """(per-TensorCore VMEM bytes, number of TensorCores per chip).

    Conservative defaults (v7x-like: 64 MiB / 2 TC) if the query fails."""
    vmem = 64 << 20
    num_tc = 2
    try:
        info = pltpu.get_tpu_info()
        v = getattr(info, "vmem_capacity_bytes", None)
        if v:
            vmem = int(v)
        cores = getattr(info, "num_cores", None) or getattr(info, "core_count", None)
        if cores:
            num_tc = int(cores)
        else:
            # v7x has 64 MiB VMEM per TC and 2 TCs/chip; v5e/v6e have 128 MiB, 1 TC.
            num_tc = 2 if vmem <= (64 << 20) else 1
    except Exception:
        try:
            kind = jax.devices()[0].device_kind.lower()
            if ("v5" in kind) or ("v6" in kind):
                vmem, num_tc = 128 << 20, 1
        except Exception:
            pass
    return vmem, num_tc


def split_attention(x, w1, w2, k):
    """x: (B, K, H, W, C); w1: (C, C) = mlp1.weight.T; w2: (C, K*C) = mlp2.weight.T.

    Returns (B, H, W, C)."""
    b, kk, h, w, c = x.shape
    assert kk == k
    assert w1.shape == (c, c) and w2.shape == (c, k * c)
    hw = h * w
    itemsize = jnp.dtype(x.dtype).itemsize

    # --- layout: lane-dense flat whenever channels tile evenly into 128 lanes --
    use_flat = (c < 128) and (128 % c == 0)
    if use_flat:
        flat_len = hw * c
        pad = (-flat_len) % 128
        rows = (flat_len + pad) // 128
        lanes = 128
        g = 128 // c
        xf = x.reshape(b, k, flat_len)
        if pad:
            # Zeros are neutral for both the reduction and the weighted sum;
            # the padded output lanes are sliced off below.
            xf = jnp.pad(xf, ((0, 0), (0, 0), (0, pad)))
        xr = xf.reshape(b, k, rows, lanes)
    else:
        # Direct layout (already lane-dense when C % 128 == 0).
        rows, lanes, g = hw, c, 1
        xr = x.reshape(b, k, hw, c)

    # --- generation-aware VMEM budget / cap -------------------------------------
    vmem_bytes, num_tc = _tpu_vmem_and_cores()
    budget = int(0.35 * vmem_bytes)
    cap = int(0.78 * vmem_bytes)

    def _chunk_rows(bt):
        # Keep roughly bt*chunk ~ 512 sublane rows of f32 temporaries live.
        return min(rows, max(8, (512 // max(1, bt)) // 8 * 8))

    def step_bytes(bt):
        x_b = bt * k * rows * lanes * itemsize
        o_b = bt * rows * lanes * itemsize
        w_b = (c * c + c * k * c) * itemsize          # single-buffered weights
        temps = 4 * bt * _chunk_rows(bt) * lanes * 4  # f32 chunk temporaries
        return 2 * (x_b + o_b) + w_b + temps

    # --- pick batch tile Bt ------------------------------------------------------
    # 2-TC chips (v7x): prefer >= 4 parallel grid steps for load balance.
    # 1-TC chips (v5e/v6e): simply take the largest Bt that fits the budget.
    desired_steps = 4 if num_tc >= 2 else 1
    eff_min_steps = min(desired_steps, b)
    batch_tile = 1
    for d in range(1, b + 1):
        if b % d != 0:
            continue
        if step_bytes(d) <= budget and (b // d) >= eff_min_steps:
            batch_tile = d
    grid = (b // batch_tile,)
    chunk = _chunk_rows(batch_tile)

    vmem_limit = int(min(max(step_bytes(batch_tile) + (8 << 20), 32 << 20), cap))

    cost = pl.CostEstimate(
        flops=2 * b * (c * c + c * k * c) + 3 * b * k * hw * c,
        transcendentals=b * (c + k * c),
        bytes_accessed=(b * (k + 1) * hw * c + c * c + c * k * c) * itemsize,
    )
    compiler_params = pltpu.CompilerParams(
        dimension_semantics=("parallel",),
        vmem_limit_bytes=vmem_limit,
    )

    kernel = _make_kernel(k, c, g, chunk)

    def _run(single_buffer_weights):
        if single_buffer_weights:
            w1_spec = pl.BlockSpec((c, c), lambda i: (0, 0),
                                   pipeline_mode=pl.Buffered(1))
            w2_spec = pl.BlockSpec((c, k * c), lambda i: (0, 0),
                                   pipeline_mode=pl.Buffered(1))
        else:
            w1_spec = pl.BlockSpec((c, c), lambda i: (0, 0))
            w2_spec = pl.BlockSpec((c, k * c), lambda i: (0, 0))
        return pl.pallas_call(
            kernel,
            out_shape=jax.ShapeDtypeStruct((b, rows, lanes), x.dtype),
            grid_spec=pltpu.PrefetchScalarGridSpec(
                num_scalar_prefetch=0,
                grid=grid,
                in_specs=[
                    pl.BlockSpec((batch_tile, k, rows, lanes),
                                 lambda i: (i, 0, 0, 0)),
                    w1_spec,
                    w2_spec,
                ],
                out_specs=pl.BlockSpec((batch_tile, rows, lanes),
                                       lambda i: (i, 0, 0)),
            ),
            compiler_params=compiler_params,
            cost_estimate=cost,
        )(xr, w1, w2)

    try:
        out = _run(True)    # constant-index weights: single-buffered (saves VMEM)
    except Exception:
        out = _run(False)   # portability fallback (default double buffering)

    if use_flat:
        return out.reshape(b, rows * lanes)[:, :hw * c].reshape(b, h, w, c)
    return out.reshape(b, h, w, c)


def split_attention_ref(x, w1, w2, k):
    """Pure-JAX reference mirroring the PyTorch forward."""
    b, kk, h, w, c = x.shape
    xr = x.reshape(b, kk, -1, c)
    a = jnp.sum(jnp.sum(xr, axis=1), axis=1)                      # (b, c)
    hat = _gelu_exact(a @ w1) @ w2                                # (b, k*c)
    hat = hat.reshape(b, k, c)
    bar = jax.nn.softmax(hat, axis=1)
    out = jnp.sum(bar[:, :, None, :] * xr, axis=1)                # (b, hw, c)
    return out.reshape(b, h, w, c)


if __name__ == "__main__":
    B, K, H, W, C = 2, 3, 8, 8, 32

    key = jax.random.PRNGKey(0)
    kx, k1, k2 = jax.random.split(key, 3)

    x = jax.random.normal(kx, (B, K, H, W, C), dtype=jnp.float32)
    # Deterministic synthetic weights (mlp1: Linear(C, C), mlp2: Linear(C, C*K)),
    # stored pre-transposed so y = x @ w matches torch's x @ weight.T (bias=False).
    w1 = jax.random.normal(k1, (C, C), dtype=jnp.float32) * 0.05
    w2 = jax.random.normal(k2, (C, K * C), dtype=jnp.float32) * 0.05

    out = split_attention(x, w1, w2, K)
    out = jax.block_until_ready(out)

    ref = split_attention_ref(x, w1, w2, K)
    assert out.shape == (B, H, W, C)
    assert jnp.allclose(out, ref, atol=1e-4, rtol=1e-4), "mismatch vs reference"

    print("KERNEL_OK")
</pallas_src>

<mosaic_0001>
module attributes {stable_mosaic.version = 11 : i64} {
  func.func @kernel(%arg0: i32, %arg1: memref<1x3x16x128xf32, #tpu.memory_space<vmem>>, %arg2: memref<32x32xf32, #tpu.memory_space<vmem>>, %arg3: memref<32x96xf32, #tpu.memory_space<vmem>>, %arg4: memref<1x16x128xf32, #tpu.memory_space<vmem>>) attributes {dimension_semantics = [#tpu.dimension_semantics<parallel>], iteration_bounds = array<i64: 2>, scalar_prefetch = 0 : i64, scratch_operands = 0 : i64, tpu.core_type = #tpu.core_type<tc>, window_params = [{transform_indices = @transform_0, window_bounds = array<i64: 1, 3, 16, 128>}, {pipeline_mode = #tpu.pipeline_mode<synchronous>, transform_indices = @transform_1, window_bounds = array<i64: 32, 32>}, {pipeline_mode = #tpu.pipeline_mode<synchronous>, transform_indices = @transform_2, window_bounds = array<i64: 32, 96>}, {transform_indices = @transform_3, window_bounds = array<i64: 1, 16, 128>}]} {
    %cst = arith.constant 0.000000e+00 : f32
    %0 = vector.broadcast %cst : f32 to vector<1x128xf32>
    %c0_i32 = arith.constant 0 : i32
    %c16_i32 = arith.constant 16 : i32
    %1 = arith.muli %c0_i32, %c16_i32 : i32
    %2 = tpu.assume_multiple %1, 16 : i32
    %cst_0 = arith.constant 0.000000e+00 : f32
    %3 = vector.broadcast %cst_0 : f32 to vector<1x128xf32>
    %c0 = arith.constant 0 : index
    %c0_1 = arith.constant 0 : index
    %4 = arith.index_cast %2 : i32 to index
    %c0_2 = arith.constant 0 : index
    %5 = vector.load %arg1[%c0, %c0_1, %4, %c0_2] : memref<1x3x16x128xf32, #tpu.memory_space<vmem>>, vector<1x1x16x128xf32>
    %6 = vector.shape_cast %5 : vector<1x1x16x128xf32> to vector<1x16x128xf32>
    %cst_3 = arith.constant dense<0.000000e+00> : vector<1x128xf32>
    %7 = vector.multi_reduction <add>, %6, %cst_3 [1] : vector<1x16x128xf32> to vector<1x128xf32>
    %8 = arith.addf %3, %7 : vector<1x128xf32>
    %c0_4 = arith.constant 0 : index
    %c1 = arith.constant 1 : index
    %9 = arith.index_cast %2 : i32 to index
    %c0_5 = arith.constant 0 : index
    %10 = vector.load %arg1[%c0_4, %c1, %9, %c0_5] : memref<1x3x16x128xf32, #tpu.memory_space<vmem>>, vector<1x1x16x128xf32>
    %11 = vector.shape_cast %10 : vector<1x1x16x128xf32> to vector<1x16x128xf32>
    %cst_6 = arith.constant dense<0.000000e+00> : vector<1x128xf32>
    %12 = vector.multi_reduction <add>, %11, %cst_6 [1] : vector<1x16x128xf32> to vector<1x128xf32>
    %13 = arith.addf %8, %12 : vector<1x128xf32>
    %c0_7 = arith.constant 0 : index
    %c2 = arith.constant 2 : index
    %14 = arith.index_cast %2 : i32 to index
    %c0_8 = arith.constant 0 : index
    %15 = vector.load %arg1[%c0_7, %c2, %14, %c0_8] : memref<1x3x16x128xf32, #tpu.memory_space<vmem>>, vector<1x1x16x128xf32>
    %16 = vector.shape_cast %15 : vector<1x1x16x128xf32> to vector<1x16x128xf32>
    %cst_9 = arith.constant dense<0.000000e+00> : vector<1x128xf32>
    %17 = vector.multi_reduction <add>, %16, %cst_9 [1] : vector<1x16x128xf32> to vector<1x128xf32>
    %18 = arith.addf %13, %17 : vector<1x128xf32>
    %19 = arith.addf %0, %18 : vector<1x128xf32>
    %c1_i32 = arith.constant 1 : i32
    %20 = vector.extract_strided_slice %19 {offsets = [0, 0], sizes = [1, 32], strides = [1, 1]} : vector<1x128xf32> to vector<1x32xf32>
    %21 = vector.extract_strided_slice %19 {offsets = [0, 32], sizes = [1, 32], strides = [1, 1]} : vector<1x128xf32> to vector<1x32xf32>
    %22 = arith.addf %20, %21 : vector<1x32xf32>
    %23 = vector.extract_strided_slice %19 {offsets = [0, 64], sizes = [1, 32], strides = [1, 1]} : vector<1x128xf32> to vector<1x32xf32>
    %24 = arith.addf %22, %23 : vector<1x32xf32>
    %25 = vector.extract_strided_slice %19 {offsets = [0, 96], sizes = [1, 32], strides = [1, 1]} : vector<1x128xf32> to vector<1x32xf32>
    %26 = arith.addf %24, %25 : vector<1x32xf32>
    %c0_10 = arith.constant 0 : index
    %c0_11 = arith.constant 0 : index
    %27 = vector.load %arg2[%c0_10, %c0_11] : memref<32x32xf32, #tpu.memory_space<vmem>>, vector<32x32xf32>
    %cst_12 = arith.constant dense<0.000000e+00> : vector<1x32xf32>
    %28 = tpu.matmul %26, %27, %cst_12 {dimension_numbers = #tpu.dot_dimension_numbers<[1], [0], [0], [1], [0, 0, 1, 1], [], []>} : vector<1x32xf32>, vector<32x32xf32>, vector<1x32xf32> -> vector<1x32xf32>
    %cst_13 = arith.constant 5.000000e-01 : f32
    %29 = vector.broadcast %cst_13 : f32 to vector<1x32xf32>
    %30 = arith.mulf %29, %28 : vector<1x32xf32>
    %cst_14 = arith.constant 0.707106769 : f32
    %31 = vector.broadcast %cst_14 : f32 to vector<1x32xf32>
    %32 = arith.mulf %28, %31 : vector<1x32xf32>
    %33 = math.erf %32 : vector<1x32xf32>
    %cst_15 = arith.constant 1.000000e+00 : f32
    %34 = vector.broadcast %cst_15 : f32 to vector<1x32xf32>
    %35 = arith.addf %34, %33 : vector<1x32xf32>
    %36 = arith.mulf %30, %35 : vector<1x32xf32>
    %c0_16 = arith.constant 0 : index
    %c0_17 = arith.constant 0 : index
    %37 = vector.load %arg3[%c0_16, %c0_17] : memref<32x96xf32, #tpu.memory_space<vmem>>, vector<32x96xf32>
    %cst_18 = arith.constant dense<0.000000e+00> : vector<1x96xf32>
    %38 = tpu.matmul %36, %37, %cst_18 {dimension_numbers = #tpu.dot_dimension_numbers<[1], [0], [0], [1], [0, 0, 1, 1], [], []>} : vector<1x32xf32>, vector<32x96xf32>, vector<1x96xf32> -> vector<1x96xf32>
    %39 = vector.shape_cast %38 : vector<1x96xf32> to vector<1x3x32xf32>
    %cst_19 = arith.constant dense<0xFF800000> : vector<1x32xf32>
    %40 = vector.multi_reduction <maximumf>, %39, %cst_19 [1] : vector<1x3x32xf32> to vector<1x32xf32>
    %41 = vector.shape_cast %40 : vector<1x32xf32> to vector<1x1x32xf32>
    %42 = vector.broadcast %41 : vector<1x1x32xf32> to vector<1x3x32xf32>
    %43 = arith.subf %39, %42 : vector<1x3x32xf32>
    %44 = math.exp %43 : vector<1x3x32xf32>
    %cst_20 = arith.constant dense<0.000000e+00> : vector<1x32xf32>
    %45 = vector.multi_reduction <add>, %44, %cst_20 [1] : vector<1x3x32xf32> to vector<1x32xf32>
    %46 = vector.shape_cast %45 : vector<1x32xf32> to vector<1x1x32xf32>
    %47 = vector.broadcast %46 : vector<1x1x32xf32> to vector<1x3x32xf32>
    %48 = arith.divf %44, %47 : vector<1x3x32xf32>
    %49 = tpu.concatenate %48, %48, %48, %48 in 2 : vector<1x3x32xf32>, vector<1x3x32xf32>, vector<1x3x32xf32>, vector<1x3x32xf32> -> vector<1x3x128xf32>
    %c0_i32_21 = arith.constant 0 : i32
    %c1_i32_22 = arith.constant 1 : i32
    %50 = arith.muli %c0_i32_21, %c1_i32_22 : i32
    %c0_i32_23 = arith.constant 0 : i32
    %51 = arith.addi %c0_i32_23, %50 : i32
    %c16_i32_24 = arith.constant 16 : i32
    %52 = arith.muli %51, %c16_i32_24 : i32
    %53 = tpu.assume_multiple %52, 16 : i32
    %c0_25 = arith.constant 0 : index
    %c0_26 = arith.constant 0 : index
    %54 = arith.index_cast %53 : i32 to index
    %c0_27 = arith.constant 0 : index
    %55 = vector.load %arg1[%c0_25, %c0_26, %54, %c0_27] : memref<1x3x16x128xf32, #tpu.memory_space<vmem>>, vector<1x1x16x128xf32>
    %56 = vector.shape_cast %55 : vector<1x1x16x128xf32> to vector<1x16x128xf32>
    %57 = vector.extract_strided_slice %49 {offsets = [0, 0, 0], sizes = [1, 1, 128], strides = [1, 1, 1]} : vector<1x3x128xf32> to vector<1x1x128xf32>
    %58 = vector.broadcast %57 : vector<1x1x128xf32> to vector<1x16x128xf32>
    %59 = arith.mulf %56, %58 : vector<1x16x128xf32>
    %c0_28 = arith.constant 0 : index
    %c1_29 = arith.constant 1 : index
    %60 = arith.index_cast %53 : i32 to index
    %c0_30 = arith.constant 0 : index
    %61 = vector.load %arg1[%c0_28, %c1_29, %60, %c0_30] : memref<1x3x16x128xf32, #tpu.memory_space<vmem>>, vector<1x1x16x128xf32>
    %62 = vector.shape_cast %61 : vector<1x1x16x128xf32> to vector<1x16x128xf32>
    %63 = vector.extract_strided_slice %49 {offsets = [0, 1, 0], sizes = [1, 1, 128], strides = [1, 1, 1]} : vector<1x3x128xf32> to vector<1x1x128xf32>
    %64 = vector.broadcast %63 : vector<1x1x128xf32> to vector<1x16x128xf32>
    %65 = arith.mulf %62, %64 : vector<1x16x128xf32>
    %66 = arith.addf %59, %65 : vector<1x16x128xf32>
    %c0_31 = arith.constant 0 : index
    %c2_32 = arith.constant 2 : index
    %67 = arith.index_cast %53 : i32 to index
    %c0_33 = arith.constant 0 : index
    %68 = vector.load %arg1[%c0_31, %c2_32, %67, %c0_33] : memref<1x3x16x128xf32, #tpu.memory_space<vmem>>, vector<1x1x16x128xf32>
    %69 = vector.shape_cast %68 : vector<1x1x16x128xf32> to vector<1x16x128xf32>
    %70 = vector.extract_strided_slice %49 {offsets = [0, 2, 0], sizes = [1, 1, 128], strides = [1, 1, 1]} : vector<1x3x128xf32> to vector<1x1x128xf32>
    %71 = vector.broadcast %70 : vector<1x1x128xf32> to vector<1x16x128xf32>
    %72 = arith.mulf %69, %71 : vector<1x16x128xf32>
    %73 = arith.addf %66, %72 : vector<1x16x128xf32>
    %c0_34 = arith.constant 0 : index
    %74 = arith.index_cast %53 : i32 to index
    %c0_35 = arith.constant 0 : index
    %75 = vector.load %arg4[%c0_34, %74, %c0_35] : memref<1x16x128xf32, #tpu.memory_space<vmem>>, vector<1x16x128xf32>
    tpu.vector_store %arg4[%c0_34, %74, %c0_35], %73 {strides = array<i32>} : memref<1x16x128xf32, #tpu.memory_space<vmem>>, vector<1x16x128xf32>,
    %c1_i32_36 = arith.constant 1 : i32
    return
  }
  func.func @transform_0(%arg0: i32) -> (i32, i32, i32, i32) {
    %c0_i32 = arith.constant 0 : i32
    %c0_i32_0 = arith.constant 0 : i32
    %c0_i32_1 = arith.constant 0 : i32
    %c0_i32_2 = arith.constant 0 : i32
    return %arg0, %c0_i32, %c0_i32_0, %c0_i32_1 : i32, i32, i32, i32
  }
  func.func @transform_1(%arg0: i32) -> (i32, i32) {
    %c0_i32 = arith.constant 0 : i32
    %c0_i32_0 = arith.constant 0 : i32
    %c0_i32_1 = arith.constant 0 : i32
    return %c0_i32, %c0_i32_0 : i32, i32
  }
  func.func @transform_2(%arg0: i32) -> (i32, i32) {
    %c0_i32 = arith.constant 0 : i32
    %c0_i32_0 = arith.constant 0 : i32
    %c0_i32_1 = arith.constant 0 : i32
    return %c0_i32, %c0_i32_0 : i32, i32
  }
  func.func @transform_3(%arg0: i32) -> (i32, i32, i32) {
    %c0_i32 = arith.constant 0 : i32
    %c0_i32_0 = arith.constant 0 : i32
    %c0_i32_1 = arith.constant 0 : i32
    return %arg0, %c0_i32, %c0_i32_0 : i32, i32, i32
  }
}

module attributes {stable_mosaic.version = 11 : i64} {
  func.func @kernel(%arg0: i32, %arg1: memref<1x3x16x128xf32, #tpu.memory_space<vmem>>, %arg2: memref<32x32xf32, #tpu.memory_space<vmem>>, %arg3: memref<32x96xf32, #tpu.memory_space<vmem>>, %arg4: memref<1x16x128xf32, #tpu.memory_space<vmem>>) attributes {dimension_semantics = [#tpu.dimension_semantics<parallel>], iteration_bounds = array<i64: 2>, scalar_prefetch = 0 : i64, scratch_operands = 0 : i64, tpu.core_type = #tpu.core_type<tc>, window_params = [{transform_indices = @transform_0, window_bounds = array<i64: 1, 3, 16, 128>}, {pipeline_mode = #tpu.pipeline_mode<synchronous>, transform_indices = @transform_1, window_bounds = array<i64: 32, 32>}, {pipeline_mode = #tpu.pipeline_mode<synchronous>, transform_indices = @transform_2, window_bounds = array<i64: 32, 96>}, {transform_indices = @transform_3, window_bounds = array<i64: 1, 16, 128>}]} {
    %cst = arith.constant 0.000000e+00 : f32
    %0 = vector.broadcast %cst : f32 to vector<1x128xf32>
    %c0_i32 = arith.constant 0 : i32
    %c16_i32 = arith.constant 16 : i32
    %1 = arith.muli %c0_i32, %c16_i32 : i32
    %2 = tpu.assume_multiple %1, 16 : i32
    %cst_0 = arith.constant 0.000000e+00 : f32
    %3 = vector.broadcast %cst_0 : f32 to vector<1x128xf32>
    %c0 = arith.constant 0 : index
    %c0_1 = arith.constant 0 : index
    %4 = arith.index_cast %2 : i32 to index
    %c0_2 = arith.constant 0 : index
    %5 = vector.load %arg1[%c0, %c0_1, %4, %c0_2] : memref<1x3x16x128xf32, #tpu.memory_space<vmem>>, vector<1x1x16x128xf32>
    %6 = vector.shape_cast %5 : vector<1x1x16x128xf32> to vector<1x16x128xf32>
    %cst_3 = arith.constant dense<0.000000e+00> : vector<1x128xf32>
    %7 = vector.multi_reduction <add>, %6, %cst_3 [1] : vector<1x16x128xf32> to vector<1x128xf32>
    %8 = arith.addf %3, %7 : vector<1x128xf32>
    %c0_4 = arith.constant 0 : index
    %c1 = arith.constant 1 : index
    %9 = arith.index_cast %2 : i32 to index
    %c0_5 = arith.constant 0 : index
    %10 = vector.load %arg1[%c0_4, %c1, %9, %c0_5] : memref<1x3x16x128xf32, #tpu.memory_space<vmem>>, vector<1x1x16x128xf32>
    %11 = vector.shape_cast %10 : vector<1x1x16x128xf32> to vector<1x16x128xf32>
    %cst_6 = arith.constant dense<0.000000e+00> : vector<1x128xf32>
    %12 = vector.multi_reduction <add>, %11, %cst_6 [1] : vector<1x16x128xf32> to vector<1x128xf32>
    %13 = arith.addf %8, %12 : vector<1x128xf32>
    %c0_7 = arith.constant 0 : index
    %c2 = arith.constant 2 : index
    %14 = arith.index_cast %2 : i32 to index
    %c0_8 = arith.constant 0 : index
    %15 = vector.load %arg1[%c0_7, %c2, %14, %c0_8] : memref<1x3x16x128xf32, #tpu.memory_space<vmem>>, vector<1x1x16x128xf32>
    %16 = vector.shape_cast %15 : vector<1x1x16x128xf32> to vector<1x16x128xf32>
    %cst_9 = arith.constant dense<0.000000e+00> : vector<1x128xf32>
    %17 = vector.multi_reduction <add>, %16, %cst_9 [1] : vector<1x16x128xf32> to vector<1x128xf32>
    %18 = arith.addf %13, %17 : vector<1x128xf32>
    %19 = arith.addf %0, %18 : vector<1x128xf32>
    %c1_i32 = arith.constant 1 : i32
    %20 = vector.extract_strided_slice %19 {offsets = [0, 0], sizes = [1, 32], strides = [1, 1]} : vector<1x128xf32> to vector<1x32xf32>
    %21 = vector.extract_strided_slice %19 {offsets = [0, 32], sizes = [1, 32], strides = [1, 1]} : vector<1x128xf32> to vector<1x32xf32>
    %22 = arith.addf %20, %21 : vector<1x32xf32>
    %23 = vector.extract_strided_slice %19 {offsets = [0, 64], sizes = [1, 32], strides = [1, 1]} : vector<1x128xf32> to vector<1x32xf32>
    %24 = arith.addf %22, %23 : vector<1x32xf32>
    %25 = vector.extract_strided_slice %19 {offsets = [0, 96], sizes = [1, 32], strides = [1, 1]} : vector<1x128xf32> to vector<1x32xf32>
    %26 = arith.addf %24, %25 : vector<1x32xf32>
    %c0_10 = arith.constant 0 : index
    %c0_11 = arith.constant 0 : index
    %27 = vector.load %arg2[%c0_10, %c0_11] : memref<32x32xf32, #tpu.memory_space<vmem>>, vector<32x32xf32>
    %cst_12 = arith.constant dense<0.000000e+00> : vector<1x32xf32>
    %28 = tpu.matmul %26, %27, %cst_12 {dimension_numbers = #tpu.dot_dimension_numbers<[1], [0], [0], [1], [0, 0, 1, 1], [], []>} : vector<1x32xf32>, vector<32x32xf32>, vector<1x32xf32> -> vector<1x32xf32>
    %cst_13 = arith.constant 5.000000e-01 : f32
    %29 = vector.broadcast %cst_13 : f32 to vector<1x32xf32>
    %30 = arith.mulf %29, %28 : vector<1x32xf32>
    %cst_14 = arith.constant 0.707106769 : f32
    %31 = vector.broadcast %cst_14 : f32 to vector<1x32xf32>
    %32 = arith.mulf %28, %31 : vector<1x32xf32>
    %33 = math.erf %32 : vector<1x32xf32>
    %cst_15 = arith.constant 1.000000e+00 : f32
    %34 = vector.broadcast %cst_15 : f32 to vector<1x32xf32>
    %35 = arith.addf %34, %33 : vector<1x32xf32>
    %36 = arith.mulf %30, %35 : vector<1x32xf32>
    %c0_16 = arith.constant 0 : index
    %c0_17 = arith.constant 0 : index
    %37 = vector.load %arg3[%c0_16, %c0_17] : memref<32x96xf32, #tpu.memory_space<vmem>>, vector<32x96xf32>
    %cst_18 = arith.constant dense<0.000000e+00> : vector<1x96xf32>
    %38 = tpu.matmul %36, %37, %cst_18 {dimension_numbers = #tpu.dot_dimension_numbers<[1], [0], [0], [1], [0, 0, 1, 1], [], []>} : vector<1x32xf32>, vector<32x96xf32>, vector<1x96xf32> -> vector<1x96xf32>
    %39 = vector.shape_cast %38 : vector<1x96xf32> to vector<1x3x32xf32>
    %cst_19 = arith.constant dense<0xFF800000> : vector<1x32xf32>
    %40 = vector.multi_reduction <maximumf>, %39, %cst_19 [1] : vector<1x3x32xf32> to vector<1x32xf32>
    %41 = vector.shape_cast %40 : vector<1x32xf32> to vector<1x1x32xf32>
    %42 = vector.broadcast %41 : vector<1x1x32xf32> to vector<1x3x32xf32>
    %43 = arith.subf %39, %42 : vector<1x3x32xf32>
    %44 = math.exp %43 : vector<1x3x32xf32>
    %cst_20 = arith.constant dense<0.000000e+00> : vector<1x32xf32>
    %45 = vector.multi_reduction <add>, %44, %cst_20 [1] : vector<1x3x32xf32> to vector<1x32xf32>
    %46 = vector.shape_cast %45 : vector<1x32xf32> to vector<1x1x32xf32>
    %47 = vector.broadcast %46 : vector<1x1x32xf32> to vector<1x3x32xf32>
    %48 = arith.divf %44, %47 : vector<1x3x32xf32>
    %49 = tpu.concatenate %48, %48, %48, %48 in 2 : vector<1x3x32xf32>, vector<1x3x32xf32>, vector<1x3x32xf32>, vector<1x3x32xf32> -> vector<1x3x128xf32>
    %c0_i32_21 = arith.constant 0 : i32
    %c1_i32_22 = arith.constant 1 : i32
    %50 = arith.muli %c0_i32_21, %c1_i32_22 : i32
    %c0_i32_23 = arith.constant 0 : i32
    %51 = arith.addi %c0_i32_23, %50 : i32
    %c16_i32_24 = arith.constant 16 : i32
    %52 = arith.muli %51, %c16_i32_24 : i32
    %53 = tpu.assume_multiple %52, 16 : i32
    %c0_25 = arith.constant 0 : index
    %c0_26 = arith.constant 0 : index
    %54 = arith.index_cast %53 : i32 to index
    %c0_27 = arith.constant 0 : index
    %55 = vector.load %arg1[%c0_25, %c0_26, %54, %c0_27] : memref<1x3x16x128xf32, #tpu.memory_space<vmem>>, vector<1x1x16x128xf32>
    %56 = vector.shape_cast %55 : vector<1x1x16x128xf32> to vector<1x16x128xf32>
    %57 = vector.extract_strided_slice %49 {offsets = [0, 0, 0], sizes = [1, 1, 128], strides = [1, 1, 1]} : vector<1x3x128xf32> to vector<1x1x128xf32>
    %58 = vector.broadcast %57 : vector<1x1x128xf32> to vector<1x16x128xf32>
    %59 = arith.mulf %56, %58 : vector<1x16x128xf32>
    %c0_28 = arith.constant 0 : index
    %c1_29 = arith.constant 1 : index
    %60 = arith.index_cast %53 : i32 to index
    %c0_30 = arith.constant 0 : index
    %61 = vector.load %arg1[%c0_28, %c1_29, %60, %c0_30] : memref<1x3x16x128xf32, #tpu.memory_space<vmem>>, vector<1x1x16x128xf32>
    %62 = vector.shape_cast %61 : vector<1x1x16x128xf32> to vector<1x16x128xf32>
    %63 = vector.extract_strided_slice %49 {offsets = [0, 1, 0], sizes = [1, 1, 128], strides = [1, 1, 1]} : vector<1x3x128xf32> to vector<1x1x128xf32>
    %64 = vector.broadcast %63 : vector<1x1x128xf32> to vector<1x16x128xf32>
    %65 = arith.mulf %62, %64 : vector<1x16x128xf32>
    %66 = arith.addf %59, %65 : vector<1x16x128xf32>
    %c0_31 = arith.constant 0 : index
    %c2_32 = arith.constant 2 : index
    %67 = arith.index_cast %53 : i32 to index
    %c0_33 = arith.constant 0 : index
    %68 = vector.load %arg1[%c0_31, %c2_32, %67, %c0_33] : memref<1x3x16x128xf32, #tpu.memory_space<vmem>>, vector<1x1x16x128xf32>
    %69 = vector.shape_cast %68 : vector<1x1x16x128xf32> to vector<1x16x128xf32>
    %70 = vector.extract_strided_slice %49 {offsets = [0, 2, 0], sizes = [1, 1, 128], strides = [1, 1, 1]} : vector<1x3x128xf32> to vector<1x1x128xf32>
    %71 = vector.broadcast %70 : vector<1x1x128xf32> to vector<1x16x128xf32>
    %72 = arith.mulf %69, %71 : vector<1x16x128xf32>
    %73 = arith.addf %66, %72 : vector<1x16x128xf32>
    %c0_34 = arith.constant 0 : index
    %74 = arith.index_cast %53 : i32 to index
    %c0_35 = arith.constant 0 : index
    %75 = vector.load %arg4[%c0_34, %74, %c0_35] : memref<1x16x128xf32, #tpu.memory_space<vmem>>, vector<1x16x128xf32>
    tpu.vector_store %arg4[%c0_34, %74, %c0_35], %73 {strides = array<i32>} : memref<1x16x128xf32, #tpu.memory_space<vmem>>, vector<1x16x128xf32>,
    %c1_i32_36 = arith.constant 1 : i32
    return
  }
  func.func @transform_0(%arg0: i32) -> (i32, i32, i32, i32) {
    %c0_i32 = arith.constant 0 : i32
    %c0_i32_0 = arith.constant 0 : i32
    %c0_i32_1 = arith.constant 0 : i32
    %c0_i32_2 = arith.constant 0 : i32
    return %arg0, %c0_i32, %c0_i32_0, %c0_i32_1 : i32, i32, i32, i32
  }
  func.func @transform_1(%arg0: i32) -> (i32, i32) {
    %c0_i32 = arith.constant 0 : i32
    %c0_i32_0 = arith.constant 0 : i32
    %c0_i32_1 = arith.constant 0 : i32
    return %c0_i32, %c0_i32_0 : i32, i32
  }
  func.func @transform_2(%arg0: i32) -> (i32, i32) {
    %c0_i32 = arith.constant 0 : i32
    %c0_i32_0 = arith.constant 0 : i32
    %c0_i32_1 = arith.constant 0 : i32
    return %c0_i32, %c0_i32_0 : i32, i32
  }
  func.func @transform_3(%arg0: i32) -> (i32, i32, i32) {
    %c0_i32 = arith.constant 0 : i32
    %c0_i32_0 = arith.constant 0 : i32
    %c0_i32_1 = arith.constant 0 : i32
    return %arg0, %c0_i32, %c0_i32_0 : i32, i32, i32
  }
}

</mosaic_0001>

<bundles_post_ra>
// kernel: tpu_custom_call.1
= control target key start
LH: loop header
LB: loop body
LE: loop exit
PB: predicated region body
PF: predicated region fallthrough
CT: control target
= control target key end

     0   :  { %8 = vsyncpa [#allocation3], 0  ;;  %s1243_s0 = inlined_call_operand.hbm [shape: f32[2,3,16,128], index: 0, kind: input, shape index: {}]   ;;  %s1244_s1 = inlined_call_operand.hbm [shape: f32[32,32], index: 1, kind: input, shape index: {}]   ;;  %s1245_s2 = inlined_call_operand.hbm [shape: f32[32,96], index: 2, kind: input, shape index: {}]   ;;  %s1246_s3 = inlined_call_operand.hbm [shape: f32[2,16,128], index: 3, kind: output, shape index: {}]  }
   0x1   :  { %10 = vsyncpa [#allocation3 + $0x1], 0 }
   0x2   :  { %11 = vsyncpa [#allocation6], 0 }
   0x3   :  { %12 = vsyncpa [#allocation4], 0 }
   0x4   :  { %14 = vsyncpa [#allocation4 + $0x1], 0  ;;  %s964_s12 = smov 0   ;;  %s966_s13 = smov 0  }
   0x5   :  { %s968_s14 = smov 0   ;;  %s970_s15 = smov 0  }
   0x6 LB: > { %s985_s16 = sadd.s32 4294967295, %s926_s15   ;;  %s616_s17 = sadd.s32 4294967294, %s926_s15   ;;  %s926_s15 = sphi %s970_s15, %s1266_s15   ;;  %s922_s14 = sphi %s968_s14, %s1265_s14   ;;  %s918_s13 = sphi %s966_s13, %s1264_s13   ;;  %s914_s12 = sphi %s964_s12, %s1263_s12  }
   0x7   : > { %p40_p0 = scmp.ne.s32.totalorder %s918_s13, %s914_s12  ;;  %p1247_p1 = scmp.eq.s32.totalorder %s985_s16, 0 }
   0x8   : > { %p112_p3 = scmp.eq.s32.totalorder %s616_s17, 1  ;;  %p617_p5 = scmp.ge.s32.totalorder %s926_s15, 1 }
   0x9   : > { %p994_p4 = por %p1247_p1, %p40_p0  ;;  %p119_p7 = scmp.lt.s32.totalorder %s926_s15, 3 }
   0xa   : > { %p999_p6 = por %p112_p3, %p40_p0  ;;  %s928_s21 = smov [#allocation5]  }
   0xb   : > { %s1250_s18 = scalar_select %p994_p4, 1, 0 }
   0xc   : > { %s1251_s19 = scalar_select %p999_p6, 1, 0 }
   0xd   : > { %p1004_p8 = pnand %p617_p5, %p119_p7  ;;  %s131_s22 = sshll.u32 %s928_s21, 4  ;;  %s1008_s22 = int_to_ptr.vmem [resolvable:$true] %s131_s22 }
   0xe   : > { %s929_s24 = smov [#allocation7]   ;;  %s770_s28 = scalar_lea.hbm %s1244_s1, 512 }
   0xf   : > { %p697_p9 = pneg %p1004_p8  ;;  %s144_s25 = sshll.u32 %s929_s24, 4  ;;  %s1019_s25 = int_to_ptr.vmem [resolvable:$true] %s144_s25 }
  0x10   : > { %p771_p12 = scmp.ne.s32.totalorder %s1244_s1, %s770_s28  ;;  %p777_p5 = scmp.lt.u32.totalorder %s770_s28, %s1244_s1 }
  0x11   : > { %p1015_p11 = pnand %p697_p9, %p1247_p1 }
  0x13   : > { %p772_p13 = pneg %p1015_p11 }
  0x15   : > { %p773_p0 = pnand %p772_p13, %p771_p12 }
  0x17   : > { %p774_p3 = pneg %p773_p0 }
  0x19   : > { %p779_p7 = pnand %p777_p5, %p774_p3 }
  0x1b   : > { %782 = shalt.err (!%p779_p7)
}
  0x1c   : > { %s783_s6 = scalar_lea.vmem %s1008_s22, 512  ;;  %p791_p2 = scmp.lt.s32.totalorder %s1008_s22, %s1008_s22 }
  0x1d   : > { %p784_p9 = scmp.ne.s32.totalorder %s1008_s22, %s783_s6  ;;  %p792_p12 = scmp.lt.s32.totalorder %s783_s6, %s783_s6 }
  0x1f   : > { %p786_p10 = pnand %p784_p9, %p772_p13  ;;  %p793_p0 = por %p792_p12, %p791_p2 }
  0x21   : > { %p787_p1 = pneg %p786_p10 }
  0x23   : > { %p794_p6 = pnand %p793_p0, %p787_p1 }
  0x25   : > { %797 = shalt.err (!%p794_p6)
}
  0x26   : > { %s930_s7 = smov 128   ;;  %s931_s8 = smov 8  }
  0x27   : > { %700 = dma.hbm_to_vmem [thread:$0]  (!%p1015_p11), %s1244_s1, 512, %s1008_s22, [#allocation6], %s930_s7, %s930_s7, %s931_s8  }
  0x28   : > { %s798_s21 = scalar_lea.hbm %s1245_s2, 512 }
  0x29   : > { %p799_p1 = scmp.ne.s32.totalorder %s1245_s2, %s798_s21  ;;  %p805_p10 = scmp.lt.u32.totalorder %s798_s21, %s1245_s2 }
  0x2b   : > { %p801_p2 = pnand %p799_p1, %p772_p13 }
  0x2d   : > { %p802_p6 = pneg %p801_p2 }
  0x2f   : > { %p807_p3 = pnand %p805_p10, %p802_p6 }
  0x31   : > { %810 = shalt.err (!%p807_p3)
}
  0x32   : > { %s811_s22 = scalar_lea.vmem %s1019_s25, 512  ;;  %p819_p12 = scmp.lt.s32.totalorder %s1019_s25, %s1019_s25 }
  0x33   : > { %p812_p5 = scmp.ne.s32.totalorder %s1019_s25, %s811_s22  ;;  %p820_p0 = scmp.lt.s32.totalorder %s811_s22, %s811_s22 }
  0x35   : > { %p814_p7 = pnand %p812_p5, %p772_p13  ;;  %p821_p1 = por %p820_p0, %p819_p12 }
  0x37   : > { %p815_p9 = pneg %p814_p7 }
  0x39   : > { %p822_p2 = pnand %p821_p1, %p815_p9 }
  0x3b   : > { %825 = shalt.err (!%p822_p2)
}
  0x3c   : > { %703 = dma.hbm_to_vmem [thread:$0]  (!%p1015_p11), %s1245_s2, 512, %s1019_s25, [#allocation6], %s930_s7, %s930_s7, %s931_s8  }
  0x3d   : > { %s1080_s23 = sadd.s32 1, %s926_s15   ;;  %s27_s4 = sadd.s32 1, %s922_s14 }
  0x3e   : > { %s24_s5 = ssub.s32 %s926_s15, %s1080_s23  ;;  %p34_p13 = scmp.ne.s32.totalorder %s922_s14, %s918_s13 }
  0x3f   : > { %p25_p6 = scmp.eq.s32.totalorder %s24_s5, 0  ;;  %p35_p10 = scmp.eq.s32.totalorder %s926_s15, 0 }
  0x40   : > { %p1254_p3 = scmp.eq.s32.totalorder %s985_s16, 1  ;;  %p714_p7 = scmp.lt.s32.totalorder %s926_s15, 2 }
  0x41   : > { %s1096_s9 = scalar_select %p25_p6, %s922_s14, %s27_s4  }
  0x42   : > { %p1090_p5 = por %p1254_p3, %p34_p13  ;;  %p36_p9 = por %p35_p10, %p34_p13 }
  0x43   : > { %s158_s10 = sand.u32 1, %s922_s14   ;;  %s683_s25 = smul.u32 768, %s926_s15 }
  0x44   : > { %s1255_s6 = scalar_select %p1090_p5, 1, 0 }
  0x45   : > { %s682_s11 = smul.u32 48, %s158_s10  ;;  %p1100_p11 = pnand %p714_p7, %p36_p9 }
  0x46   : > { %s1107_s26 = scalar_lea.hbm %s1243_s0, %s683_s25  ;;  %s1111_s22 = scalar_lea.sflag [#allocation3], %s158_s10 }
  0x47   : > { %s162_s27 = scalar_lea.vmem [#allocation2], %s682_s11  ;;  %s826_s29 = scalar_lea.hbm %s1107_s26, 768 }
  0x48   : > { %s169_s28 = sshll.u32 %s162_s27, 4  ;;  %p827_p12 = scmp.ne.s32.totalorder %s1107_s26, %s826_s29  ;;  %s1109_s28 = int_to_ptr.vmem [resolvable:$true] %s169_s28 }
  0x49   : > { %p828_p0 = pneg %p1100_p11  ;;  %s831_s5 = scalar_lea.hbm %s1243_s0, 1536 }
  0x4a   : > { %p832_p13 = scmp.lt.u32.totalorder %s1107_s26, %s1243_s0  ;;  %p833_p6 = scmp.lt.u32.totalorder %s831_s5, %s826_s29 }
  0x4b   : > { %p829_p1 = pnand %p828_p0, %p827_p12  ;;  %p835_p3 = scmp.lt.u32.totalorder %s826_s29, %s1107_s26 }
  0x4c   : > { %p834_p10 = por %p833_p6, %p832_p13 }
  0x4d   : > { %p830_p2 = pneg %p829_p1 }
  0x4e   : > { %p836_p7 = por %p835_p3, %p834_p10 }
  0x50   : > { %p837_p9 = pnand %p836_p7, %p830_p2 }
  0x52   : > { %840 = shalt.err (!%p837_p9)
}
  0x53   : > { %s841_s10 = scalar_lea.vmem %s1109_s28, 768  ;;  %s932_s11 = smov [#allocation2]  }
  0x54   : > { %p842_p12 = scmp.ne.s32.totalorder %s1109_s28, %s841_s10  ;;  %s846_s24 = sshll.u32 %s932_s11, 4  ;;  %s847_s24 = int_to_ptr.vmem [resolvable:$false] %s846_s24 }
  0x55   : > { %s848_s27 = scalar_lea.vmem %s847_s24, 1536  ;;  %p849_p4 = scmp.lt.s32.totalorder %s1109_s28, %s847_s24 }
  0x56   : > { %p844_p1 = pnand %p842_p12, %p828_p0  ;;  %p850_p13 = scmp.lt.s32.totalorder %s848_s27, %s841_s10 }
  0x58   : > { %p845_p5 = pneg %p844_p1  ;;  %p851_p6 = por %p850_p13, %p849_p4 }
  0x5a   : > { %p852_p10 = pnand %p851_p6, %p845_p5 }
  0x5c   : > { %855 = shalt.err (!%p852_p10)
}
  0x5d   : > { %707 = dma.hbm_to_vmem [thread:$0]  (!%p1100_p11), %s1107_s26, 768, %s1109_s28, %s1111_s22, %s930_s7, %s930_s7, %s931_s8  }
  0x5e   : > { %181 = sbr.rel (%p1004_p8) target bundleno = 1009 (0x3f1), region = 32  ;;  %s1145_s29 = sand.u32 (!%p1004_p8), 1, %s918_s13  }
  0x5f   : > { %s684_s30 = smul.u32 (!%p1004_p8), 48, %s1145_s29  ;;  %s184_s4 = scalar_lea.sflag (!%p1004_p8), [#allocation3], %s1145_s29 }
  0x60   : > { %p1257_p4 = scmp.ne.s32.totalorder (!%p1004_p8), %s1250_s18, 0 }
  0x61   : > { %s187_s5 = scalar_lea.vmem (!%p1004_p8), [#allocation2], %s684_s30 }
  0x65   : > { %901 = dma.done.wait (%p1257_p4), %s184_s4, 768  }
  0x66   : > { %903 = vsyncadd (%p1257_p4), %s184_s4, 4294966528  ;;  %p1258_p5 = scmp.eq.s32.totalorder %s985_s16, 0 }
  0x68   : > { %905 = dma.done.wait (%p1258_p5), [#allocation6], 1024   ;;  %p1259_p11 = pmov %p1258_p5 }
  0x69   : > { %v1157_v0 = vld [vmem:[%s187_s5] sm:$0xff]  ;;  %v1159_v1 = vld [vmem:[%s187_s5 + $0x8] sm:$0xff]  ;;  %v1161_v2 = vld [vmem:[%s187_s5 + $0x10] sm:$0xff]  ;;  %v933_v19 = vmov 0.0|0.0   ;;  %vm934_vm0 = vmmov 0   ;;  %v935_v34 = vmov 0.0   ;;  %v436_v60 = vlaneseq }
  0x6a   : > { %907 = vsyncadd (%p1259_p11), [#allocation6], 4294966272  ;;  %v220_v3 = vadd.f32 %v1159_v1, %v1157_v0  ;;  %v1165_v4 = vld [vmem:[%s187_s5 + $0x18] sm:$0xff]  ;;  %v1167_v5 = vld [vmem:[%s187_s5 + $0x20] sm:$0xff]  ;;  %670 = vmatprep.subr.bf16.mxu0 %v933_v19  ;;  %676 = vmatprep.subr.bf16.mxu1 %v933_v19  ;;  %s936_s18 = smov 96   ;;  %s937_s20 = smov 32  }
  0x6b   : > { %v1169_v6 = vld [vmem:[%s187_s5 + $0x28] sm:$0xff]  ;;  %v232_v7 = vadd.f32 %v1165_v4, %v1161_v2  ;;  %v266_v13 = vld [vmem:[#allocation5] sm:$0xff]  ;;  %v268_v23 = vld [vmem:[#allocation5 + $0x10] sm:$0xff]  ;;  %656 = vmatprep.mubr.msk.f32.mxu0 %vm934_vm0, %v935_v34  ;;  %667 = vmatprep.mubr.msk.f32.mxu1 %vm934_vm0, %v935_v34  ;;  %s938_s7 = smov 64   ;;  %vm270_vm1 = vcmask 261120   ;;  %v437_v62 = vshrl.u32 %v436_v60, 7 }
  0x6c   : > { %v244_v8 = vadd.f32 %v1169_v6, %v1167_v5  ;;  %v221_v9 = vrot.slane %v220_v3, 4  ;;  %v267_v14 = vld [vmem:[#allocation5 + $0x8] sm:$0xff]  ;;  %v269_v24 = vld [vmem:[#allocation5 + $0x18] sm:$0xff]  ;;  %v349_v43 = vld [vmem:[#allocation7] sm:$0xff]  ;;  %v939_v58 = vmov 1983009808  }
  0x6d   : > { %v233_v10 = vrot.slane %v232_v7, 4  ;;  %v671_v17 = vpack.c.bf16 %v267_v14, %v266_v13  ;;  %v674_v27 = vpack.c.bf16 %v269_v24, %v268_v23  ;;  %v350_v44 = vld [vmem:[#allocation7 + $0x8] sm:$0xff]  ;;  %v351_v46 = vld [vmem:[#allocation7 + $0x10] sm:$0xff]  ;;  %v352_v47 = vld [vmem:[#allocation7 + $0x18] sm:$0xff]  ;;  %v434_v59 = vunpack.c.l.s4 %v939_v58  ;;  %s625_s8 = sshll.u32 %s1145_s29, 4  ;;  %s637_s17 = sshll.u32 %s985_s16, 8 }
  0x6e   : > { %v245_v11 = vrot.slane %v244_v8, 4  ;;  %v222_v12 = vadd.f32 %v221_v9, %v220_v3  ;;  %v677_v45 = vpack.c.bf16 %v350_v44, %v349_v43  ;;  %v680_v48 = vpack.c.bf16 %v352_v47, %v351_v46  ;;  %s217_s26 = scalar_lea.vmem [#allocation8], %s625_s8  ;;  %s1197_s21 = scalar_lea.hbm %s1246_s3, %s637_s17 }
  0x6f   : > { %v234_v15 = vadd.f32 %v233_v10, %v232_v7  ;;  %672 = vmatpush3.bf16.msra.mxu0 %v671_v17  ;;  %v435_v61 = vunpack.c.0.s8 %v434_v59  ;;  %v940_v63 = vmov 1934713408   ;;  %vm449_vm2 = vcmask 256000   ;;  %s522_s28 = sshll.u32 %s217_s26, 4  ;;  %s509_s16 = scalar_lea.sflag [#allocation4], %s1145_s29  ;;  %s1199_s28 = int_to_ptr.vmem [resolvable:$true] %s522_s28 }
  0x70   : > { %v246_v16 = vadd.f32 %v245_v11, %v244_v8  ;;  %v223_v18 = vrot.slane %v222_v12, 2  ;;  %673 = vmatprep.subr.bf16.mxu0 %v933_v19  ;;  %678 = vmatpush3.bf16.msra.mxu1 %v677_v45  ;;  %v443_v3 = vunpack.c.l.s4 %v940_v63  ;;  %vm480_vm3 = vcmask 523264   ;;  %s856_s10 = scalar_lea.vmem %s1199_s28, 256  ;;  %p1260_p0 = scmp.ne.s32.totalorder %s1255_s6, 0 }
  0x71   : > { %v235_v20 = vrot.slane %v234_v15, 2  ;;  %679 = vmatprep.subr.bf16.mxu1 %v933_v19  ;;  %v438_v7 = vsub.s32 %v435_v61, %v437_v62  ;;  %vm482_vm4 = vcmask 785408   ;;  %p857_p8 = scmp.ne.s32.totalorder %s1199_s28, %s856_s10  ;;  %s941_s11 = smov [#allocation8]  }
  0x72   : > { %v247_v21 = vrot.slane %v246_v16, 2  ;;  %v224_v22 = vadd.f32 %v223_v18, %v222_v12  ;;  %v444_v8 = vunpack.c.0.s8 %v443_v3  ;;  %s860_s24 = sshll.u32 %s941_s11, 4  ;;  %s861_s24 = int_to_ptr.vmem [resolvable:$false] %s860_s24 }
  0x73   : > { %v236_v25 = vadd.f32 %v235_v20, %v234_v15  ;;  %675 = vmatpush3.bf16.msra.mxu0 %v674_v27  ;;  %p858_p2 = pnand %p857_p8, %p1260_p0  ;;  %s862_s27 = scalar_lea.vmem %s861_s24, 512 }
  0x74   : > { %v248_v26 = vadd.f32 %v247_v21, %v246_v16  ;;  %v225_v28 = vrot.slane %v224_v22, 1  ;;  %681 = vmatpush3.bf16.msra.mxu1 %v680_v48  ;;  %v447_v11 = vsub.s32 %v444_v8, %v437_v62  ;;  %p863_p7 = scmp.lt.s32.totalorder %s1199_s28, %s861_s24  ;;  %p864_p9 = scmp.lt.s32.totalorder %s862_s27, %s856_s10 }
  0x75   : > { %v237_v29 = vrot.slane %v236_v25, 1  ;;  %p859_p3 = pneg %p858_p2 }
  0x76   : > { %v249_v30 = vrot.slane %v248_v26, 1  ;;  %v226_v31 = vadd.f32 %v225_v28, %v224_v22  ;;  %p865_p12 = por %p864_p9, %p863_p7 }
  0x77   : > { %v238_v32 = vadd.f32 %v237_v29, %v236_v25 }
  0x78   : > { %v250_v33 = vadd.f32 %v249_v30, %v248_v26  ;;  %p866_p1 = pnand %p865_p12, %p859_p3 }
  0x79   : > { %v239_v35 = vadd.f32 %v238_v32, %v226_v31 }
  0x7b   : > { %v251_v36 = vadd.f32 %v250_v33, %v239_v35 }
  0x7d   : > { %254 = vrot.lane.b32.xlu0 %v251_v36, %s936_s18  ;;  %262 = vrot.lane.b32.xlu1 %v251_v36, %s937_s20 }
  0x81   : > { %258 = vrot.lane.b32.xlu0 %v251_v36, %s938_s7 }
  0xef   : > { %v255_v37 = vpop.permute.xlu0 %254  ;;  %v263_v40 = vpop.permute.xlu1 %262 }
  0xf0   : > { %v257_v38 = vadd.f32 %v255_v37, %v251_v36 }
  0xf3   : > { %v259_v39 = vpop.permute.xlu0 %258 }
  0xf4   : > { %v261_v41 = vadd.f32 %v259_v39, %v257_v38  ;;  %v486_v38 = vsub.s32 0, %v437_v62  ;;  %v492_v39 = vsub.s32 1, %v437_v62 }
  0xf6   : > { %v265_v42 = vadd.f32 %v263_v40, %v261_v41  ;;  %v500_v40 = vsub.s32 2, %v437_v62 }
  0xf8   : > { %657 = vmatmul.mubr.msk.f32.vlgmr.msra.gmra.mrb[0].mxu0 %vm270_vm1, %v265_v42 }
 0x1cb   : > { %v340_v49 = vpop.f32.mrb[0].mxu0 }
 0x1cc   : > { %v345_v50 = vmul.f32 0.70710677, %v340_v49  ;;  %v658_v51 = vpop.f32.mrb[1].mxu0  ;;  %v344_v53 = vmul.f32 0.5, %v340_v49 }
 0x1ce   : > { %764 = verf.f32 %v345_v50 }
 0x1d8   : > { %v765_v52 = vpop.eup %764 }
 0x1d9   : > { %v347_v54 = vadd.f32 1.0, %v765_v52 }
 0x1db   : > { %v348_v55 = vmul.f32 %v347_v54, %v344_v53 }
 0x1dd   : > { %668 = vmatmul.mubr.msk.f32.vlgmr.msra.gmra.mrb[0].mxu1 %vm270_vm1, %v348_v55 }
 0x2b0   : > { %v422_v56 = vpop.f32.mrb[0].mxu1 }
 0x2b1   : > { %427 = vrot.lane.b32.xlu0 %v422_v56, %s936_s18  ;;  %429 = vrot.lane.b32.xlu1 %v422_v56, %s938_s7  ;;  %v669_v57 = vpop.f32.mrb[1].mxu1 }
 0x323   : > { %v430_v9 = vpop.permute.xlu1 %429  ;;  %v428_v13 = vpop.permute.xlu0 %427 }
 0x324   : > { %v432_v10 = vcombine.low %v422_v56, %v430_v9 }
 0x326   : > { %v439_v12 = vrot.slane %v432_v10, %v438_v7 }
 0x328   : > { %v441_v14 = vcombine.low %v439_v12, %v428_v13 }
 0x32a   : > { %v448_v15 = vrot.slane %v441_v14, %v447_v11 }
 0x32c   : > { %v450_v16 = vsel %vm449_vm2, %v448_v15, -inf }
 0x32d   : > { %v451_v17 = vrot.slane %v450_v16, 4 }
 0x32f   : > { %v452_v18 = vmax.f32 %v450_v16, %v451_v17 }
 0x331   : > { %v453_v19 = vrot.slane %v452_v18, 2 }
 0x333   : > { %v454_v20 = vmax.f32 %v452_v18, %v453_v19 }
 0x335   : > { %v455_v21 = vrot.slane %v454_v20, 1 }
 0x337   : > { %v456_v22 = vmax.f32 %v454_v20, %v455_v21 }
 0x339   : > { %v457_v23 = vsub.f32 %v448_v15, %v456_v22 }
 0x33b   : > { %v458_v24 = vmul.f32 1.442695, %v457_v23 }
 0x33d   : > { %766 = vpow2.f32 %v458_v24 }
 0x347   : > { %v767_v25 = vpop.eup %766 }
 0x348   : > { %v460_v26 = vsel %vm449_vm2, %v767_v25, 0.0 }
 0x349   : > { %v461_v27 = vrot.slane %v460_v26, 4 }
 0x34b   : > { %v462_v28 = vadd.f32 %v461_v27, %v460_v26 }
 0x34d   : > { %v463_v29 = vrot.slane %v462_v28, 2 }
 0x34f   : > { %v464_v30 = vadd.f32 %v463_v29, %v462_v28 }
 0x351   : > { %v465_v31 = vrot.slane %v464_v30, 1 }
 0x353   : > { %v466_v32 = vadd.f32 %v465_v31, %v464_v30 }
 0x355   : > { %768 = vrcp.f32 %v466_v32 }
 0x35f   : > { %v769_v33 = vpop.eup %768 }
 0x360   : > { %v468_v34 = vmul.f32 %v769_v33, %v767_v25 }
 0x362   : > { %473 = vrot.lane.b32.xlu0 %v468_v34, %s938_s7  ;;  %470 = vrot.lane.b32.xlu1 %v468_v34, %s937_s20 }
 0x366   : > { %476 = vrot.lane.b32.xlu1 %v468_v34, %s936_s18 }
 0x3d4   : > { %v471_v35 = vpop.permute.xlu1 %470  ;;  %v474_v36 = vpop.permute.xlu0 %473 }
 0x3d5   : > { %v479_v37 = vsel %vm270_vm1, %v468_v34, %v471_v35 }
 0x3d6   : > { %v481_v41 = vsel %vm480_vm3, %v479_v37, %v474_v36 }
 0x3d8   : > { %v477_v42 = vpop.permute.xlu1 %476 }
 0x3d9   : > { %v483_v43 = vsel %vm482_vm4, %v481_v41, %v477_v42 }
 0x3da   : > { %v487_v44 = vrot.slane %v483_v43, %v486_v38  ;;  %v493_v45 = vrot.slane %v483_v43, %v492_v39  ;;  %v501_v46 = vrot.slane %v483_v43, %v500_v40 }
 0x3dc   : > { %v488_v47 = vmul.f32 %v487_v44, %v1157_v0  ;;  %v489_v48 = vmul.f32 %v487_v44, %v1159_v1  ;;  %v494_v49 = vmul.f32 %v1161_v2, %v493_v45  ;;  %v495_v50 = vmul.f32 %v1165_v4, %v493_v45 }
 0x3dd   : > { %v502_v53 = vmul.f32 %v1167_v5, %v501_v46  ;;  %v503_v54 = vmul.f32 %v1169_v6, %v501_v46 }
 0x3de   : > { %v496_v51 = vadd.f32 %v494_v49, %v488_v47  ;;  %v497_v52 = vadd.f32 %v495_v50, %v489_v48 }
 0x3e0   : > { %v504_v0 = vadd.f32 %v502_v53, %v496_v51  ;;  %v505_v1 = vadd.f32 %v503_v54, %v497_v52 }
 0x3e2   : > { %506 = vst [vmem:[%s217_s26] sm:$0xff] %v504_v0  ;;  %507 = vst [vmem:[%s217_s26 + $0x8] sm:$0xff] %v505_v1 }
 0x3e3   : > { %869 = shalt.err (!%p866_p1)
}
 0x3e4   : > { %s870_s30 = scalar_lea.hbm %s1197_s21, 256  ;;  %s874_s18 = scalar_lea.hbm %s1246_s3, 512 }
 0x3e5   : > { %p871_p13 = scmp.ne.s32.totalorder %s1197_s21, %s870_s30  ;;  %p875_p4 = scmp.lt.u32.totalorder %s1197_s21, %s1246_s3 }
 0x3e6   : > { %p876_p5 = scmp.lt.u32.totalorder %s874_s18, %s870_s30  ;;  %p878_p8 = scmp.lt.u32.totalorder %s870_s30, %s1197_s21 }
 0x3e7   : > { %p872_p6 = pnand %p871_p13, %p1260_p0 }
 0x3e8   : > { %p877_p11 = por %p876_p5, %p875_p4 }
 0x3e9   : > { %p873_p10 = pneg %p872_p6 }
 0x3ea   : > { %p879_p2 = por %p878_p8, %p877_p11 }
 0x3ec   : > { %p880_p3 = pnand %p879_p2, %p873_p10 }
 0x3ee   : > { %883 = shalt.err (!%p880_p3)
}
 0x3ef   : > { %s942_s8 = smov 128   ;;  %s943_s17 = smov 8  }
 0x3f0   : > { %695 = dma.vmem_to_hbm [thread:$0]  (%p1260_p0), %s1199_s28, 256, %s1197_s21, %s509_s16, %s942_s8, %s942_s8, %s943_s17  }
 0x3f1 PF: > { %s537_s26 = sand.u32 1, %s914_s12   ;;  %p1261_p7 = scmp.ne.s32.totalorder %s1251_s19, 0 }
 0x3f2   : > { %p1262_p9 = scmp.ge.s32.totalorder %s926_s15, 2  ;;  %s538_s22 = scalar_lea.sflag [#allocation4], %s537_s26 }
 0x3f4   : > { %p709_p12 = pnand %p1262_p9, %p1261_p7 }
 0x3f6   : > { %909 = dma.done.wait (!%p709_p12), %s538_s22, 256  }
 0x3f7   : > { %911 = vsyncadd (!%p709_p12), %s538_s22, 4294967040  ;;  %p17_p1 = scmp.ge.s32.totalorder %s1080_s23, 4   ;;  %s1263_s12 = smov %s918_s13 }
 0x3f8   : > { %s1264_s13 = smov %s922_s14  ;;  %s1265_s14 = smov %s1096_s9 }
 0x3f9   : > { %s1266_s15 = smov %s1080_s23  ;;  %19 = sbr.rel (!%p17_p1) target bundleno = 6 (0x6), region = 87 }
 0x400   :  { %543 = vsyncpa [#allocation3], 1 }
 0x401   :  { %545 = vsyncpa [#allocation3 + $0x1], 1 }
 0x402   :  { %546 = vsyncpa [#allocation6], 1 }
 0x403   :  { %547 = vsyncpa [#allocation4], 1 }
 0x404   :  { %549 = vsyncpa [#allocation4 + $0x1], 1 }

// kernel: tpu_custom_call.1
= control target key start
LH: loop header
LB: loop body
LE: loop exit
PB: predicated region body
PF: predicated region fallthrough
CT: control target
= control target key end

     0   :  { %8 = vsyncpa [#allocation3], 0  ;;  %s1243_s0 = inlined_call_operand.hbm [shape: f32[2,3,16,128], index: 0, kind: input, shape index: {}]   ;;  %s1244_s1 = inlined_call_operand.hbm [shape: f32[32,32], index: 1, kind: input, shape index: {}]   ;;  %s1245_s2 = inlined_call_operand.hbm [shape: f32[32,96], index: 2, kind: input, shape index: {}]   ;;  %s1246_s3 = inlined_call_operand.hbm [shape: f32[2,16,128], index: 3, kind: output, shape index: {}]  }
   0x1   :  { %10 = vsyncpa [#allocation3 + $0x1], 0 }
   0x2   :  { %11 = vsyncpa [#allocation6], 0 }
   0x3   :  { %12 = vsyncpa [#allocation4], 0 }
   0x4   :  { %14 = vsyncpa [#allocation4 + $0x1], 0  ;;  %s964_s12 = smov 0   ;;  %s966_s13 = smov 0  }
   0x5   :  { %s968_s14 = smov 0   ;;  %s970_s15 = smov 0  }
   0x6 LB: > { %s985_s16 = sadd.s32 4294967295, %s926_s15   ;;  %s616_s17 = sadd.s32 4294967294, %s926_s15   ;;  %s926_s15 = sphi %s970_s15, %s1266_s15   ;;  %s922_s14 = sphi %s968_s14, %s1265_s14   ;;  %s918_s13 = sphi %s966_s13, %s1264_s13   ;;  %s914_s12 = sphi %s964_s12, %s1263_s12  }
   0x7   : > { %p40_p0 = scmp.ne.s32.totalorder %s918_s13, %s914_s12  ;;  %p1247_p1 = scmp.eq.s32.totalorder %s985_s16, 0 }
   0x8   : > { %p112_p3 = scmp.eq.s32.totalorder %s616_s17, 1  ;;  %p617_p5 = scmp.ge.s32.totalorder %s926_s15, 1 }
   0x9   : > { %p994_p4 = por %p1247_p1, %p40_p0  ;;  %p119_p7 = scmp.lt.s32.totalorder %s926_s15, 3 }
   0xa   : > { %p999_p6 = por %p112_p3, %p40_p0  ;;  %s928_s21 = smov [#allocation5]  }
   0xb   : > { %s1250_s18 = scalar_select %p994_p4, 1, 0 }
   0xc   : > { %s1251_s19 = scalar_select %p999_p6, 1, 0 }
   0xd   : > { %p1004_p8 = pnand %p617_p5, %p119_p7  ;;  %s131_s22 = sshll.u32 %s928_s21, 4  ;;  %s1008_s22 = int_to_ptr.vmem [resolvable:$true] %s131_s22 }
   0xe   : > { %s929_s24 = smov [#allocation7]   ;;  %s770_s28 = scalar_lea.hbm %s1244_s1, 512 }
   0xf   : > { %p697_p9 = pneg %p1004_p8  ;;  %s144_s25 = sshll.u32 %s929_s24, 4  ;;  %s1019_s25 = int_to_ptr.vmem [resolvable:$true] %s144_s25 }
  0x10   : > { %p771_p12 = scmp.ne.s32.totalorder %s1244_s1, %s770_s28  ;;  %p777_p5 = scmp.lt.u32.totalorder %s770_s28, %s1244_s1 }
  0x11   : > { %p1015_p11 = pnand %p697_p9, %p1247_p1 }
  0x13   : > { %p772_p13 = pneg %p1015_p11 }
  0x15   : > { %p773_p0 = pnand %p772_p13, %p771_p12 }
  0x17   : > { %p774_p3 = pneg %p773_p0 }
  0x19   : > { %p779_p7 = pnand %p777_p5, %p774_p3 }
  0x1b   : > { %782 = shalt.err (!%p779_p7)
}
  0x1c   : > { %s783_s6 = scalar_lea.vmem %s1008_s22, 512  ;;  %p791_p2 = scmp.lt.s32.totalorder %s1008_s22, %s1008_s22 }
  0x1d   : > { %p784_p9 = scmp.ne.s32.totalorder %s1008_s22, %s783_s6  ;;  %p792_p12 = scmp.lt.s32.totalorder %s783_s6, %s783_s6 }
  0x1f   : > { %p786_p10 = pnand %p784_p9, %p772_p13  ;;  %p793_p0 = por %p792_p12, %p791_p2 }
  0x21   : > { %p787_p1 = pneg %p786_p10 }
  0x23   : > { %p794_p6 = pnand %p793_p0, %p787_p1 }
  0x25   : > { %797 = shalt.err (!%p794_p6)
}
  0x26   : > { %s930_s7 = smov 128   ;;  %s931_s8 = smov 8  }
  0x27   : > { %700 = dma.hbm_to_vmem [thread:$0]  (!%p1015_p11), %s1244_s1, 512, %s1008_s22, [#allocation6], %s930_s7, %s930_s7, %s931_s8  }
  0x28   : > { %s798_s21 = scalar_lea.hbm %s1245_s2, 512 }
  0x29   : > { %p799_p1 = scmp.ne.s32.totalorder %s1245_s2, %s798_s21  ;;  %p805_p10 = scmp.lt.u32.totalorder %s798_s21, %s1245_s2 }
  0x2b   : > { %p801_p2 = pnand %p799_p1, %p772_p13 }
  0x2d   : > { %p802_p6 = pneg %p801_p2 }
  0x2f   : > { %p807_p3 = pnand %p805_p10, %p802_p6 }
  0x31   : > { %810 = shalt.err (!%p807_p3)
}
  0x32   : > { %s811_s22 = scalar_lea.vmem %s1019_s25, 512  ;;  %p819_p12 = scmp.lt.s32.totalorder %s1019_s25, %s1019_s25 }
  0x33   : > { %p812_p5 = scmp.ne.s32.totalorder %s1019_s25, %s811_s22  ;;  %p820_p0 = scmp.lt.s32.totalorder %s811_s22, %s811_s22 }
  0x35   : > { %p814_p7 = pnand %p812_p5, %p772_p13  ;;  %p821_p1 = por %p820_p0, %p819_p12 }
  0x37   : > { %p815_p9 = pneg %p814_p7 }
  0x39   : > { %p822_p2 = pnand %p821_p1, %p815_p9 }
  0x3b   : > { %825 = shalt.err (!%p822_p2)
}
  0x3c   : > { %703 = dma.hbm_to_vmem [thread:$0]  (!%p1015_p11), %s1245_s2, 512, %s1019_s25, [#allocation6], %s930_s7, %s930_s7, %s931_s8  }
  0x3d   : > { %s1080_s23 = sadd.s32 1, %s926_s15   ;;  %s27_s4 = sadd.s32 1, %s922_s14 }
  0x3e   : > { %s24_s5 = ssub.s32 %s926_s15, %s1080_s23  ;;  %p34_p13 = scmp.ne.s32.totalorder %s922_s14, %s918_s13 }
  0x3f   : > { %p25_p6 = scmp.eq.s32.totalorder %s24_s5, 0  ;;  %p35_p10 = scmp.eq.s32.totalorder %s926_s15, 0 }
  0x40   : > { %p1254_p3 = scmp.eq.s32.totalorder %s985_s16, 1  ;;  %p714_p7 = scmp.lt.s32.totalorder %s926_s15, 2 }
  0x41   : > { %s1096_s9 = scalar_select %p25_p6, %s922_s14, %s27_s4  }
  0x42   : > { %p1090_p5 = por %p1254_p3, %p34_p13  ;;  %p36_p9 = por %p35_p10, %p34_p13 }
  0x43   : > { %s158_s10 = sand.u32 1, %s922_s14   ;;  %s683_s25 = smul.u32 768, %s926_s15 }
  0x44   : > { %s1255_s6 = scalar_select %p1090_p5, 1, 0 }
  0x45   : > { %s682_s11 = smul.u32 48, %s158_s10  ;;  %p1100_p11 = pnand %p714_p7, %p36_p9 }
  0x46   : > { %s1107_s26 = scalar_lea.hbm %s1243_s0, %s683_s25  ;;  %s1111_s22 = scalar_lea.sflag [#allocation3], %s158_s10 }
  0x47   : > { %s162_s27 = scalar_lea.vmem [#allocation2], %s682_s11  ;;  %s826_s29 = scalar_lea.hbm %s1107_s26, 768 }
  0x48   : > { %s169_s28 = sshll.u32 %s162_s27, 4  ;;  %p827_p12 = scmp.ne.s32.totalorder %s1107_s26, %s826_s29  ;;  %s1109_s28 = int_to_ptr.vmem [resolvable:$true] %s169_s28 }
  0x49   : > { %p828_p0 = pneg %p1100_p11  ;;  %s831_s5 = scalar_lea.hbm %s1243_s0, 1536 }
  0x4a   : > { %p832_p13 = scmp.lt.u32.totalorder %s1107_s26, %s1243_s0  ;;  %p833_p6 = scmp.lt.u32.totalorder %s831_s5, %s826_s29 }
  0x4b   : > { %p829_p1 = pnand %p828_p0, %p827_p12  ;;  %p835_p3 = scmp.lt.u32.totalorder %s826_s29, %s1107_s26 }
  0x4c   : > { %p834_p10 = por %p833_p6, %p832_p13 }
  0x4d   : > { %p830_p2 = pneg %p829_p1 }
  0x4e   : > { %p836_p7 = por %p835_p3, %p834_p10 }
  0x50   : > { %p837_p9 = pnand %p836_p7, %p830_p2 }
  0x52   : > { %840 = shalt.err (!%p837_p9)
}
  0x53   : > { %s841_s10 = scalar_lea.vmem %s1109_s28, 768  ;;  %s932_s11 = smov [#allocation2]  }
  0x54   : > { %p842_p12 = scmp.ne.s32.totalorder %s1109_s28, %s841_s10  ;;  %s846_s24 = sshll.u32 %s932_s11, 4  ;;  %s847_s24 = int_to_ptr.vmem [resolvable:$false] %s846_s24 }
  0x55   : > { %s848_s27 = scalar_lea.vmem %s847_s24, 1536  ;;  %p849_p4 = scmp.lt.s32.totalorder %s1109_s28, %s847_s24 }
  0x56   : > { %p844_p1 = pnand %p842_p12, %p828_p0  ;;  %p850_p13 = scmp.lt.s32.totalorder %s848_s27, %s841_s10 }
  0x58   : > { %p845_p5 = pneg %p844_p1  ;;  %p851_p6 = por %p850_p13, %p849_p4 }
  0x5a   : > { %p852_p10 = pnand %p851_p6, %p845_p5 }
  0x5c   : > { %855 = shalt.err (!%p852_p10)
}
  0x5d   : > { %707 = dma.hbm_to_vmem [thread:$0]  (!%p1100_p11), %s1107_s26, 768, %s1109_s28, %s1111_s22, %s930_s7, %s930_s7, %s931_s8  }
  0x5e   : > { %181 = sbr.rel (%p1004_p8) target bundleno = 1009 (0x3f1), region = 32  ;;  %s1145_s29 = sand.u32 (!%p1004_p8), 1, %s918_s13  }
  0x5f   : > { %s684_s30 = smul.u32 (!%p1004_p8), 48, %s1145_s29  ;;  %s184_s4 = scalar_lea.sflag (!%p1004_p8), [#allocation3], %s1145_s29 }
  0x60   : > { %p1257_p4 = scmp.ne.s32.totalorder (!%p1004_p8), %s1250_s18, 0 }
  0x61   : > { %s187_s5 = scalar_lea.vmem (!%p1004_p8), [#allocation2], %s684_s30 }
  0x65   : > { %901 = dma.done.wait (%p1257_p4), %s184_s4, 768  }
  0x66   : > { %903 = vsyncadd (%p1257_p4), %s184_s4, 4294966528  ;;  %p1258_p5 = scmp.eq.s32.totalorder %s985_s16, 0 }
  0x68   : > { %905 = dma.done.wait (%p1258_p5), [#allocation6], 1024   ;;  %p1259_p11 = pmov %p1258_p5 }
  0x69   : > { %v1157_v0 = vld [vmem:[%s187_s5] sm:$0xff]  ;;  %v1159_v1 = vld [vmem:[%s187_s5 + $0x8] sm:$0xff]  ;;  %v1161_v2 = vld [vmem:[%s187_s5 + $0x10] sm:$0xff]  ;;  %v933_v19 = vmov 0.0|0.0   ;;  %vm934_vm0 = vmmov 0   ;;  %v935_v34 = vmov 0.0   ;;  %v436_v60 = vlaneseq }
  0x6a   : > { %907 = vsyncadd (%p1259_p11), [#allocation6], 4294966272  ;;  %v220_v3 = vadd.f32 %v1159_v1, %v1157_v0  ;;  %v1165_v4 = vld [vmem:[%s187_s5 + $0x18] sm:$0xff]  ;;  %v1167_v5 = vld [vmem:[%s187_s5 + $0x20] sm:$0xff]  ;;  %670 = vmatprep.subr.bf16.mxu0 %v933_v19  ;;  %676 = vmatprep.subr.bf16.mxu1 %v933_v19  ;;  %s936_s18 = smov 96   ;;  %s937_s20 = smov 32  }
  0x6b   : > { %v1169_v6 = vld [vmem:[%s187_s5 + $0x28] sm:$0xff]  ;;  %v232_v7 = vadd.f32 %v1165_v4, %v1161_v2  ;;  %v266_v13 = vld [vmem:[#allocation5] sm:$0xff]  ;;  %v268_v23 = vld [vmem:[#allocation5 + $0x10] sm:$0xff]  ;;  %656 = vmatprep.mubr.msk.f32.mxu0 %vm934_vm0, %v935_v34  ;;  %667 = vmatprep.mubr.msk.f32.mxu1 %vm934_vm0, %v935_v34  ;;  %s938_s7 = smov 64   ;;  %vm270_vm1 = vcmask 261120   ;;  %v437_v62 = vshrl.u32 %v436_v60, 7 }
  0x6c   : > { %v244_v8 = vadd.f32 %v1169_v6, %v1167_v5  ;;  %v221_v9 = vrot.slane %v220_v3, 4  ;;  %v267_v14 = vld [vmem:[#allocation5 + $0x8] sm:$0xff]  ;;  %v269_v24 = vld [vmem:[#allocation5 + $0x18] sm:$0xff]  ;;  %v349_v43 = vld [vmem:[#allocation7] sm:$0xff]  ;;  %v939_v58 = vmov 1983009808  }
  0x6d   : > { %v233_v10 = vrot.slane %v232_v7, 4  ;;  %v671_v17 = vpack.c.bf16 %v267_v14, %v266_v13  ;;  %v674_v27 = vpack.c.bf16 %v269_v24, %v268_v23  ;;  %v350_v44 = vld [vmem:[#allocation7 + $0x8] sm:$0xff]  ;;  %v351_v46 = vld [vmem:[#allocation7 + $0x10] sm:$0xff]  ;;  %v352_v47 = vld [vmem:[#allocation7 + $0x18] sm:$0xff]  ;;  %v434_v59 = vunpack.c.l.s4 %v939_v58  ;;  %s625_s8 = sshll.u32 %s1145_s29, 4  ;;  %s637_s17 = sshll.u32 %s985_s16, 8 }
  0x6e   : > { %v245_v11 = vrot.slane %v244_v8, 4  ;;  %v222_v12 = vadd.f32 %v221_v9, %v220_v3  ;;  %v677_v45 = vpack.c.bf16 %v350_v44, %v349_v43  ;;  %v680_v48 = vpack.c.bf16 %v352_v47, %v351_v46  ;;  %s217_s26 = scalar_lea.vmem [#allocation8], %s625_s8  ;;  %s1197_s21 = scalar_lea.hbm %s1246_s3, %s637_s17 }
  0x6f   : > { %v234_v15 = vadd.f32 %v233_v10, %v232_v7  ;;  %672 = vmatpush3.bf16.msra.mxu0 %v671_v17  ;;  %v435_v61 = vunpack.c.0.s8 %v434_v59  ;;  %v940_v63 = vmov 1934713408   ;;  %vm449_vm2 = vcmask 256000   ;;  %s522_s28 = sshll.u32 %s217_s26, 4  ;;  %s509_s16 = scalar_lea.sflag [#allocation4], %s1145_s29  ;;  %s1199_s28 = int_to_ptr.vmem [resolvable:$true] %s522_s28 }
  0x70   : > { %v246_v16 = vadd.f32 %v245_v11, %v244_v8  ;;  %v223_v18 = vrot.slane %v222_v12, 2  ;;  %673 = vmatprep.subr.bf16.mxu0 %v933_v19  ;;  %678 = vmatpush3.bf16.msra.mxu1 %v677_v45  ;;  %v443_v3 = vunpack.c.l.s4 %v940_v63  ;;  %vm480_vm3 = vcmask 523264   ;;  %s856_s10 = scalar_lea.vmem %s1199_s28, 256  ;;  %p1260_p0 = scmp.ne.s32.totalorder %s1255_s6, 0 }
  0x71   : > { %v235_v20 = vrot.slane %v234_v15, 2  ;;  %679 = vmatprep.subr.bf16.mxu1 %v933_v19  ;;  %v438_v7 = vsub.s32 %v435_v61, %v437_v62  ;;  %vm482_vm4 = vcmask 785408   ;;  %p857_p8 = scmp.ne.s32.totalorder %s1199_s28, %s856_s10  ;;  %s941_s11 = smov [#allocation8]  }
  0x72   : > { %v247_v21 = vrot.slane %v246_v16, 2  ;;  %v224_v22 = vadd.f32 %v223_v18, %v222_v12  ;;  %v444_v8 = vunpack.c.0.s8 %v443_v3  ;;  %s860_s24 = sshll.u32 %s941_s11, 4  ;;  %s861_s24 = int_to_ptr.vmem [resolvable:$false] %s860_s24 }
  0x73   : > { %v236_v25 = vadd.f32 %v235_v20, %v234_v15  ;;  %675 = vmatpush3.bf16.msra.mxu0 %v674_v27  ;;  %p858_p2 = pnand %p857_p8, %p1260_p0  ;;  %s862_s27 = scalar_lea.vmem %s861_s24, 512 }
  0x74   : > { %v248_v26 = vadd.f32 %v247_v21, %v246_v16  ;;  %v225_v28 = vrot.slane %v224_v22, 1  ;;  %681 = vmatpush3.bf16.msra.mxu1 %v680_v48  ;;  %v447_v11 = vsub.s32 %v444_v8, %v437_v62  ;;  %p863_p7 = scmp.lt.s32.totalorder %s1199_s28, %s861_s24  ;;  %p864_p9 = scmp.lt.s32.totalorder %s862_s27, %s856_s10 }
  0x75   : > { %v237_v29 = vrot.slane %v236_v25, 1  ;;  %p859_p3 = pneg %p858_p2 }
  0x76   : > { %v249_v30 = vrot.slane %v248_v26, 1  ;;  %v226_v31 = vadd.f32 %v225_v28, %v224_v22  ;;  %p865_p12 = por %p864_p9, %p863_p7 }
  0x77   : > { %v238_v32 = vadd.f32 %v237_v29, %v236_v25 }
  0x78   : > { %v250_v33 = vadd.f32 %v249_v30, %v248_v26  ;;  %p866_p1 = pnand %p865_p12, %p859_p3 }
  0x79   : > { %v239_v35 = vadd.f32 %v238_v32, %v226_v31 }
  0x7b   : > { %v251_v36 = vadd.f32 %v250_v33, %v239_v35 }
  0x7d   : > { %254 = vrot.lane.b32.xlu0 %v251_v36, %s936_s18  ;;  %262 = vrot.lane.b32.xlu1 %v251_v36, %s937_s20 }
  0x81   : > { %258 = vrot.lane.b32.xlu0 %v251_v36, %s938_s7 }
  0xef   : > { %v255_v37 = vpop.permute.xlu0 %254  ;;  %v263_v40 = vpop.permute.xlu1 %262 }
  0xf0   : > { %v257_v38 = vadd.f32 %v255_v37, %v251_v36 }
  0xf3   : > { %v259_v39 = vpop.permute.xlu0 %258 }
  0xf4   : > { %v261_v41 = vadd.f32 %v259_v39, %v257_v38  ;;  %v486_v38 = vsub.s32 0, %v437_v62  ;;  %v492_v39 = vsub.s32 1, %v437_v62 }
  0xf6   : > { %v265_v42 = vadd.f32 %v263_v40, %v261_v41  ;;  %v500_v40 = vsub.s32 2, %v437_v62 }
  0xf8   : > { %657 = vmatmul.mubr.msk.f32.vlgmr.msra.gmra.mrb[0].mxu0 %vm270_vm1, %v265_v42 }
 0x1cb   : > { %v340_v49 = vpop.f32.mrb[0].mxu0 }
 0x1cc   : > { %v345_v50 = vmul.f32 0.70710677, %v340_v49  ;;  %v658_v51 = vpop.f32.mrb[1].mxu0  ;;  %v344_v53 = vmul.f32 0.5, %v340_v49 }
 0x1ce   : > { %764 = verf.f32 %v345_v50 }
 0x1d8   : > { %v765_v52 = vpop.eup %764 }
 0x1d9   : > { %v347_v54 = vadd.f32 1.0, %v765_v52 }
 0x1db   : > { %v348_v55 = vmul.f32 %v347_v54, %v344_v53 }
 0x1dd   : > { %668 = vmatmul.mubr.msk.f32.vlgmr.msra.gmra.mrb[0].mxu1 %vm270_vm1, %v348_v55 }
 0x2b0   : > { %v422_v56 = vpop.f32.mrb[0].mxu1 }
 0x2b1   : > { %427 = vrot.lane.b32.xlu0 %v422_v56, %s936_s18  ;;  %429 = vrot.lane.b32.xlu1 %v422_v56, %s938_s7  ;;  %v669_v57 = vpop.f32.mrb[1].mxu1 }
 0x323   : > { %v430_v9 = vpop.permute.xlu1 %429  ;;  %v428_v13 = vpop.permute.xlu0 %427 }
 0x324   : > { %v432_v10 = vcombine.low %v422_v56, %v430_v9 }
 0x326   : > { %v439_v12 = vrot.slane %v432_v10, %v438_v7 }
 0x328   : > { %v441_v14 = vcombine.low %v439_v12, %v428_v13 }
 0x32a   : > { %v448_v15 = vrot.slane %v441_v14, %v447_v11 }
 0x32c   : > { %v450_v16 = vsel %vm449_vm2, %v448_v15, -inf }
 0x32d   : > { %v451_v17 = vrot.slane %v450_v16, 4 }
 0x32f   : > { %v452_v18 = vmax.f32 %v450_v16, %v451_v17 }
 0x331   : > { %v453_v19 = vrot.slane %v452_v18, 2 }
 0x333   : > { %v454_v20 = vmax.f32 %v452_v18, %v453_v19 }
 0x335   : > { %v455_v21 = vrot.slane %v454_v20, 1 }
 0x337   : > { %v456_v22 = vmax.f32 %v454_v20, %v455_v21 }
 0x339   : > { %v457_v23 = vsub.f32 %v448_v15, %v456_v22 }
 0x33b   : > { %v458_v24 = vmul.f32 1.442695, %v457_v23 }
 0x33d   : > { %766 = vpow2.f32 %v458_v24 }
 0x347   : > { %v767_v25 = vpop.eup %766 }
 0x348   : > { %v460_v26 = vsel %vm449_vm2, %v767_v25, 0.0 }
 0x349   : > { %v461_v27 = vrot.slane %v460_v26, 4 }
 0x34b   : > { %v462_v28 = vadd.f32 %v461_v27, %v460_v26 }
 0x34d   : > { %v463_v29 = vrot.slane %v462_v28, 2 }
 0x34f   : > { %v464_v30 = vadd.f32 %v463_v29, %v462_v28 }
 0x351   : > { %v465_v31 = vrot.slane %v464_v30, 1 }
 0x353   : > { %v466_v32 = vadd.f32 %v465_v31, %v464_v30 }
 0x355   : > { %768 = vrcp.f32 %v466_v32 }
 0x35f   : > { %v769_v33 = vpop.eup %768 }
 0x360   : > { %v468_v34 = vmul.f32 %v769_v33, %v767_v25 }
 0x362   : > { %473 = vrot.lane.b32.xlu0 %v468_v34, %s938_s7  ;;  %470 = vrot.lane.b32.xlu1 %v468_v34, %s937_s20 }
 0x366   : > { %476 = vrot.lane.b32.xlu1 %v468_v34, %s936_s18 }
 0x3d4   : > { %v471_v35 = vpop.permute.xlu1 %470  ;;  %v474_v36 = vpop.permute.xlu0 %473 }
 0x3d5   : > { %v479_v37 = vsel %vm270_vm1, %v468_v34, %v471_v35 }
 0x3d6   : > { %v481_v41 = vsel %vm480_vm3, %v479_v37, %v474_v36 }
 0x3d8   : > { %v477_v42 = vpop.permute.xlu1 %476 }
 0x3d9   : > { %v483_v43 = vsel %vm482_vm4, %v481_v41, %v477_v42 }
 0x3da   : > { %v487_v44 = vrot.slane %v483_v43, %v486_v38  ;;  %v493_v45 = vrot.slane %v483_v43, %v492_v39  ;;  %v501_v46 = vrot.slane %v483_v43, %v500_v40 }
 0x3dc   : > { %v488_v47 = vmul.f32 %v487_v44, %v1157_v0  ;;  %v489_v48 = vmul.f32 %v487_v44, %v1159_v1  ;;  %v494_v49 = vmul.f32 %v1161_v2, %v493_v45  ;;  %v495_v50 = vmul.f32 %v1165_v4, %v493_v45 }
 0x3dd   : > { %v502_v53 = vmul.f32 %v1167_v5, %v501_v46  ;;  %v503_v54 = vmul.f32 %v1169_v6, %v501_v46 }
 0x3de   : > { %v496_v51 = vadd.f32 %v494_v49, %v488_v47  ;;  %v497_v52 = vadd.f32 %v495_v50, %v489_v48 }
 0x3e0   : > { %v504_v0 = vadd.f32 %v502_v53, %v496_v51  ;;  %v505_v1 = vadd.f32 %v503_v54, %v497_v52 }
 0x3e2   : > { %506 = vst [vmem:[%s217_s26] sm:$0xff] %v504_v0  ;;  %507 = vst [vmem:[%s217_s26 + $0x8] sm:$0xff] %v505_v1 }
 0x3e3   : > { %869 = shalt.err (!%p866_p1)
}
 0x3e4   : > { %s870_s30 = scalar_lea.hbm %s1197_s21, 256  ;;  %s874_s18 = scalar_lea.hbm %s1246_s3, 512 }
 0x3e5   : > { %p871_p13 = scmp.ne.s32.totalorder %s1197_s21, %s870_s30  ;;  %p875_p4 = scmp.lt.u32.totalorder %s1197_s21, %s1246_s3 }
 0x3e6   : > { %p876_p5 = scmp.lt.u32.totalorder %s874_s18, %s870_s30  ;;  %p878_p8 = scmp.lt.u32.totalorder %s870_s30, %s1197_s21 }
 0x3e7   : > { %p872_p6 = pnand %p871_p13, %p1260_p0 }
 0x3e8   : > { %p877_p11 = por %p876_p5, %p875_p4 }
 0x3e9   : > { %p873_p10 = pneg %p872_p6 }
 0x3ea   : > { %p879_p2 = por %p878_p8, %p877_p11 }
 0x3ec   : > { %p880_p3 = pnand %p879_p2, %p873_p10 }
 0x3ee   : > { %883 = shalt.err (!%p880_p3)
}
 0x3ef   : > { %s942_s8 = smov 128   ;;  %s943_s17 = smov 8  }
 0x3f0   : > { %695 = dma.vmem_to_hbm [thread:$0]  (%p1260_p0), %s1199_s28, 256, %s1197_s21, %s509_s16, %s942_s8, %s942_s8, %s943_s17  }
 0x3f1 PF: > { %s537_s26 = sand.u32 1, %s914_s12   ;;  %p1261_p7 = scmp.ne.s32.totalorder %s1251_s19, 0 }
 0x3f2   : > { %p1262_p9 = scmp.ge.s32.totalorder %s926_s15, 2  ;;  %s538_s22 = scalar_lea.sflag [#allocation4], %s537_s26 }
 0x3f4   : > { %p709_p12 = pnand %p1262_p9, %p1261_p7 }
 0x3f6   : > { %909 = dma.done.wait (!%p709_p12), %s538_s22, 256  }
 0x3f7   : > { %911 = vsyncadd (!%p709_p12), %s538_s22, 4294967040  ;;  %p17_p1 = scmp.ge.s32.totalorder %s1080_s23, 4   ;;  %s1263_s12 = smov %s918_s13 }
 0x3f8   : > { %s1264_s13 = smov %s922_s14  ;;  %s1265_s14 = smov %s1096_s9 }
 0x3f9   : > { %s1266_s15 = smov %s1080_s23  ;;  %19 = sbr.rel (!%p17_p1) target bundleno = 6 (0x6), region = 87 }
 0x400   :  { %543 = vsyncpa [#allocation3], 1 }
 0x401   :  { %545 = vsyncpa [#allocation3 + $0x1], 1 }
 0x402   :  { %546 = vsyncpa [#allocation6], 1 }
 0x403   :  { %547 = vsyncpa [#allocation4], 1 }
 0x404   :  { %549 = vsyncpa [#allocation4 + $0x1], 1 }

</bundles_post_ra>
